<compile_context>
chip_gen: v6e
topology: v6e:2x2x1
jax: 0.10.0
libtpu: 0.0.40
codegen_flags: <defaults>
</compile_context>

<pallas_src>
import functools

import jax
import jax.numpy as jnp
from jax.experimental import pallas as pl
from jax.experimental.pallas import tpu as pltpu

BN_EPS = 1e-5


def _round_up(x, m):
    return (x + m - 1) // m * m


def _pad2(a, rows, cols):
    """Zero-pad a 2-D array up to (rows, cols); no-op if already that shape."""
    if a.shape == (rows, cols):
        return a
    return jnp.pad(a, ((0, rows - a.shape[0]), (0, cols - a.shape[1])))


def _vmem_cap_bytes():
    try:
        return int(pltpu.get_tpu_info().vmem_capacity_bytes)
    except Exception:
        return 64 << 20  # conservative: v7x per-TensorCore VMEM


def mlp_kernel(x_ref, w1_ref, gamma_ref, beta_ref, w2_ref, b2_ref, o_ref, *,
               n_rows):
    """One (core, hidden-tile) grid step.

    h = x @ w1_tile -> train-mode BN (per-feature batch stats, affine folded
    into one scale/shift) -> ReLU -> o += h_act @ w2_tile.  The f32 output
    block is resident across the hidden (reduction) axis and doubles as the
    accumulator; core 0 seeds it with the Linear-2 bias.
    """
    core = pl.program_id(0)
    k = pl.program_id(1)

    @pl.when(k == 0)
    def _init():
        b2_row = jnp.broadcast_to(b2_ref[...].astype(jnp.float32), o_ref.shape)
        o_ref[...] = jnp.where(core == 0, b2_row, jnp.zeros_like(b2_row))

    # Linear 1 for this hidden tile (MXU, f32 accumulation).  The Linear-1
    # bias is intentionally omitted: train-mode BatchNorm subtracts the batch
    # mean right after, so it cancels exactly.
    # TODO(synk): reinstate b1 if this kernel is reused with eval-mode
    # (running-stats) BatchNorm.
    h = jnp.dot(x_ref[...], w1_ref[...], preferred_element_type=jnp.float32)

    # BatchNorm1d (train mode): one-pass sum / sum-of-squares stats, affine
    # folded into a single per-feature scale/shift so only one VPU pass
    # touches h.  Padded batch rows are all-zero and padded feature columns
    # have zero gamma/beta (and zero w2 rows), so dividing by the true n_rows
    # stays exact.
    inv_n = jnp.float32(1.0 / n_rows)
    mean = jnp.sum(h, axis=0, keepdims=True) * inv_n
    var = jnp.maximum(jnp.sum(h * h, axis=0, keepdims=True) * inv_n
                      - mean * mean, 0.0)
    scale = gamma_ref[...].astype(jnp.float32) * jax.lax.rsqrt(var + BN_EPS)
    shift = beta_ref[...].astype(jnp.float32) - mean * scale
    h_act = jnp.maximum(h * scale + shift, 0.0)          # fused BN + ReLU

    # Linear 2 partial product, accumulated straight into the output block.
    o_ref[...] += jnp.dot(h_act.astype(w2_ref.dtype), w2_ref[...],
                          preferred_element_type=jnp.float32)


def prepare_mlp_params(w1, b1, gamma, beta, w2, b2, *, block_hidden=512,
                       num_cores=2):
    """Pad / lay out the MLP parameters exactly once, outside the hot path.

    Weights are (in_features, out_features); b1/gamma/beta/b2 are (features,)
    or (1, features).  b1 is accepted for API parity with the PyTorch module
    but is mathematically cancelled by the train-mode BN mean subtraction.
    """
    dim, hidden = w1.shape
    hidden_w2, proj = w2.shape
    assert hidden_w2 == hidden, "w1/w2 hidden dims disagree"
    del b1  # cancelled exactly by train-mode BatchNorm mean subtraction

    gamma = jnp.reshape(gamma, (1, hidden))
    beta = jnp.reshape(beta, (1, hidden))
    b2 = jnp.reshape(b2, (1, proj))

    dim_pad = _round_up(dim, 128)
    # Keep proj a multiple of 256 when proj > 128 (full 2x256^2 MXU columns on
    # v6e/v7x; 128 already saturates v5e's 128^2 MXU).
    proj_pad = _round_up(proj, 256) if proj > 128 else _round_up(proj, 128)

    tk = max(128, min(_round_up(block_hidden, 128), _round_up(hidden, 128)))

    # v7x has only 64 MiB of VMEM per TensorCore: shrink the hidden tile until
    # the double-buffered weight streams leave headroom for the resident x
    # block and the f32 output slab.
    cap = _vmem_cap_bytes()
    bpe_w = jnp.dtype(w1.dtype).itemsize
    while tk > 128 and 2 * tk * (dim_pad + proj_pad) * bpe_w > cap // 4:
        tk -= 128

    n_tiles = _round_up(hidden, tk) // tk
    num_cores = max(1, min(int(num_cores), n_tiles))
    hidden_pad = _round_up(hidden, tk * num_cores)
    k_tiles = hidden_pad // tk

    return dict(
        w1=_pad2(w1, dim_pad, hidden_pad),
        gamma=_pad2(gamma, 1, hidden_pad),
        beta=_pad2(beta, 1, hidden_pad),
        w2=_pad2(w2, hidden_pad, proj_pad),
        b2=_pad2(b2, 1, proj_pad),
        dim=dim, hidden=hidden, proj=proj,
        dim_pad=dim_pad, hidden_pad=hidden_pad, proj_pad=proj_pad,
        tk=tk, k_tiles=k_tiles, num_cores=num_cores,
    )


def mlp_forward(x, params, *, out_dtype=None, weight_buffers=2):
    """MLP forward: Linear -> BatchNorm1d(train) -> ReLU -> Linear."""
    n, dim = x.shape
    assert dim == params["dim"], "x feature dim does not match prepared params"
    out_dtype = x.dtype if out_dtype is None else out_dtype

    dim_pad = params["dim_pad"]
    proj_pad = params["proj_pad"]
    tk = params["tk"]
    k_tiles = params["k_tiles"]
    num_cores = params["num_cores"]
    kpc = k_tiles // num_cores                 # hidden tiles per core

    # Batch padding honours the dtype sublane packing (8 f32 / 16 bf16 / 32 i8).
    sublane = 8 * max(1, 4 // jnp.dtype(x.dtype).itemsize)
    n_pad = _round_up(n, sublane)
    x_p = _pad2(x, n_pad, dim_pad)

    def w_spec(shape, index_map):
        # Weight streams: optionally deepen the pipeline (sweep 2 -> 3 when
        # small-N per-step MXU work is too short to hide the weight DMA).
        if weight_buffers != 2:
            try:
                return pl.BlockSpec(shape, index_map,
                                    pipeline_mode=pl.Buffered(weight_buffers))
            except TypeError:          # older jax: fall back to default depth
                pass
        return pl.BlockSpec(shape, index_map)

    grid_spec = pltpu.PrefetchScalarGridSpec(
        num_scalar_prefetch=0,
        grid=(num_cores, kpc),
        in_specs=[
            pl.BlockSpec((n_pad, dim_pad), lambda c, k: (0, 0)),      # x resident
            w_spec((dim_pad, tk), lambda c, k: (0, c * kpc + k)),     # w1 tile
            pl.BlockSpec((1, tk), lambda c, k: (0, c * kpc + k)),     # gamma
            pl.BlockSpec((1, tk), lambda c, k: (0, c * kpc + k)),     # beta
            w_spec((tk, proj_pad), lambda c, k: (c * kpc + k, 0)),    # w2 tile
            pl.BlockSpec((1, proj_pad), lambda c, k: (0, 0)),         # b2 resident
        ],
        # One f32 partial slab per core; it stays resident across the hidden
        # (reduction) axis and acts as the accumulator.
        out_specs=pl.BlockSpec((None, n_pad, proj_pad), lambda c, k: (c, 0, 0)),
    )

    # VMEM budget from actual tile sizes.  x / b2 / the output slab have
    # constant block indices (single-buffered); only streamed weight tiles get
    # the buffer-depth multiplier.
    bpe_x = jnp.dtype(x_p.dtype).itemsize
    bpe_w = jnp.dtype(params["w1"].dtype).itemsize
    bufs = max(2, weight_buffers)
    need = (n_pad * dim_pad * bpe_x                       # x (resident)
            + bufs * dim_pad * tk * bpe_w                 # w1 tiles
            + bufs * 2 * tk * bpe_w                       # gamma/beta tiles
            + bufs * tk * proj_pad * bpe_w                # w2 tiles
            + proj_pad * 4                                # b2 (resident)
            + 2 * n_pad * proj_pad * 4                    # out slab + writeback
            + 3 * n_pad * tk * 4)                         # h / h_act temporaries
    need = int(need * 1.25) + (2 << 20)
    vmem_limit = min(max(need, 16 << 20), _vmem_cap_bytes() * 3 // 4)

    hidden, proj = params["hidden"], params["proj"]
    flops = 2 * n * dim * hidden + 2 * n * hidden * proj + 10 * n * hidden
    bytes_accessed = ((params["w1"].size + params["w2"].size) * bpe_w
                      + x_p.size * bpe_x
                      + (params["gamma"].size + params["beta"].size
                         + params["b2"].size) * 4
                      + num_cores * n_pad * proj_pad * 4)

    partial_slabs = pl.pallas_call(
        functools.partial(mlp_kernel, n_rows=n),
        out_shape=jax.ShapeDtypeStruct((num_cores, n_pad, proj_pad),
                                       jnp.float32),
        grid_spec=grid_spec,
        compiler_params=pltpu.CompilerParams(
            # Hidden-tile halves run on separate TensorCores on v7x; the inner
            # axis is a reduction into each core's resident slab.
            dimension_semantics=("parallel", "arbitrary"),
            vmem_limit_bytes=int(vmem_limit),
        ),
        cost_estimate=pl.CostEstimate(
            flops=int(flops), transcendentals=int(hidden),
            bytes_accessed=int(bytes_accessed)),
    )(x_p, params["w1"], params["gamma"], params["beta"],
      params["w2"], params["b2"])

    # Tiny (num_cores, N, proj) reduction + crop; b2 was folded into slab 0.
    out = jnp.sum(partial_slabs, axis=0)[:n, :proj]
    return out.astype(out_dtype)


def mlp_reference(x, w1, b1, gamma, beta, w2, b2):
    h = x @ w1 + b1
    mean = h.mean(axis=0, keepdims=True)
    var = ((h - mean) ** 2).mean(axis=0, keepdims=True)
    h = (h - mean) / jnp.sqrt(var + BN_EPS) * gamma + beta
    h = jnp.maximum(h, 0.0)
    return h @ w2 + b2


if __name__ == "__main__":
    # Small shapes consistent with MLP(dim, projection_size, hidden_size);
    # block_hidden=128 with hidden=512 gives 4 hidden tiles split 2x2 over the
    # (parallel core, arbitrary reduction) grid.
    N, dim, hidden, proj = 8, 32, 512, 16

    key = jax.random.PRNGKey(0)
    kx, k1, kb1, k2, kb2 = jax.random.split(key, 5)

    x = jax.random.normal(kx, (N, dim), dtype=jnp.float32)

    lim1 = 1.0 / float(dim) ** 0.5
    w1 = jax.random.uniform(k1, (dim, hidden), minval=-lim1, maxval=lim1,
                            dtype=jnp.float32)
    b1 = jax.random.uniform(kb1, (1, hidden), minval=-lim1, maxval=lim1,
                            dtype=jnp.float32)

    gamma = jnp.ones((1, hidden), dtype=jnp.float32)   # BatchNorm1d weight init
    beta = jnp.zeros((1, hidden), dtype=jnp.float32)   # BatchNorm1d bias init

    lim2 = 1.0 / float(hidden) ** 0.5
    w2 = jax.random.uniform(k2, (hidden, proj), minval=-lim2, maxval=lim2,
                            dtype=jnp.float32)
    b2 = jax.random.uniform(kb2, (1, proj), minval=-lim2, maxval=lim2,
                            dtype=jnp.float32)

    # Parameters are padded exactly once, outside the per-call hot path.
    params = prepare_mlp_params(w1, b1, gamma, beta, w2, b2,
                                block_hidden=128, num_cores=2)

    out = mlp_forward(x, params)
    out = jax.block_until_ready(out)

    ref = mlp_reference(x, w1, b1, gamma, beta, w2, b2)
    assert out.shape == (N, proj), out.shape
    assert jnp.allclose(out, ref, atol=1e-3, rtol=1e-3), "mismatch vs reference"

    print("KERNEL_OK")
</pallas_src>

<mosaic_0001>
module attributes {stable_mosaic.version = 11 : i64} {
  func.func @mlp_kernel(%arg0: i32, %arg1: i32, %arg2: memref<8x128xf32, #tpu.memory_space<vmem>>, %arg3: memref<128x128xf32, #tpu.memory_space<vmem>>, %arg4: memref<1x128xf32, #tpu.memory_space<vmem>>, %arg5: memref<1x128xf32, #tpu.memory_space<vmem>>, %arg6: memref<128x128xf32, #tpu.memory_space<vmem>>, %arg7: memref<1x128xf32, #tpu.memory_space<vmem>>, %arg8: memref<1x8x128xf32, #tpu.memory_space<vmem>>) attributes {dimension_semantics = [#tpu.dimension_semantics<parallel>, #tpu.dimension_semantics<arbitrary>], iteration_bounds = array<i64: 2, 2>, scalar_prefetch = 0 : i64, scratch_operands = 0 : i64, tpu.core_type = #tpu.core_type<tc>, window_params = [{pipeline_mode = #tpu.pipeline_mode<synchronous>, transform_indices = @transform_0, window_bounds = array<i64: 8, 128>}, {transform_indices = @transform_1, window_bounds = array<i64: 128, 128>}, {transform_indices = @transform_2, window_bounds = array<i64: 1, 128>}, {transform_indices = @transform_3, window_bounds = array<i64: 1, 128>}, {transform_indices = @transform_4, window_bounds = array<i64: 128, 128>}, {pipeline_mode = #tpu.pipeline_mode<synchronous>, transform_indices = @transform_5, window_bounds = array<i64: 1, 128>}, {transform_indices = @transform_6, window_bounds = array<i64: 1, 8, 128>}]} {
    %c0_i32 = arith.constant 0 : i32
    %0 = arith.cmpi eq, %arg1, %c0_i32 : i32
    %1 = arith.extui %0 : i1 to i32
    %c0_i32_0 = arith.constant 0 : i32
    %2 = arith.cmpi ne, %1, %c0_i32_0 : i32
    scf.if %2 {
      %c0_24 = arith.constant 0 : index
      %c0_25 = arith.constant 0 : index
      %41 = vector.load %arg7[%c0_24, %c0_25] : memref<1x128xf32, #tpu.memory_space<vmem>>, vector<1x128xf32>
      %42 = vector.shape_cast %41 : vector<1x128xf32> to vector<1x128xf32>
      %43 = vector.broadcast %42 : vector<1x128xf32> to vector<8x128xf32>
      %c0_i32_26 = arith.constant 0 : i32
      %44 = arith.cmpi eq, %arg0, %c0_i32_26 : i32
      %cst_27 = arith.constant 0.000000e+00 : f32
      %45 = vector.broadcast %cst_27 : f32 to vector<8x128xf32>
      %46 = arith.select %44, %43, %45 : vector<8x128xf32>
      %c0_28 = arith.constant 0 : index
      %c0_29 = arith.constant 0 : index
      %c0_30 = arith.constant 0 : index
      %47 = vector.load %arg8[%c0_28, %c0_29, %c0_30] : memref<1x8x128xf32, #tpu.memory_space<vmem>>, vector<1x8x128xf32>
      %48 = vector.shape_cast %47 : vector<1x8x128xf32> to vector<8x128xf32>
      %49 = vector.shape_cast %46 : vector<8x128xf32> to vector<1x8x128xf32>
      tpu.vector_store %arg8[%c0_28, %c0_29, %c0_30], %49 {strides = array<i32>} : memref<1x8x128xf32, #tpu.memory_space<vmem>>, vector<1x8x128xf32>,
    } else {
    }
    %c0 = arith.constant 0 : index
    %c0_1 = arith.constant 0 : index
    %3 = vector.load %arg2[%c0, %c0_1] : memref<8x128xf32, #tpu.memory_space<vmem>>, vector<8x128xf32>
    %c0_2 = arith.constant 0 : index
    %c0_3 = arith.constant 0 : index
    %4 = vector.load %arg3[%c0_2, %c0_3] : memref<128x128xf32, #tpu.memory_space<vmem>>, vector<128x128xf32>
    %cst = arith.constant dense<0.000000e+00> : vector<8x128xf32>
    %5 = tpu.matmul %3, %4, %cst {dimension_numbers = #tpu.dot_dimension_numbers<[1], [0], [0], [1], [0, 0, 1, 1], [], []>} : vector<8x128xf32>, vector<128x128xf32>, vector<8x128xf32> -> vector<8x128xf32>
    %cst_4 = arith.constant dense<0.000000e+00> : vector<128xf32>
    %6 = vector.multi_reduction <add>, %5, %cst_4 [0] : vector<8x128xf32> to vector<128xf32>
    %7 = vector.shape_cast %6 : vector<128xf32> to vector<1x128xf32>
    %cst_5 = arith.constant 1.250000e-01 : f32
    %8 = vector.broadcast %cst_5 : f32 to vector<1x128xf32>
    %9 = arith.mulf %7, %8 : vector<1x128xf32>
    %10 = arith.mulf %5, %5 : vector<8x128xf32>
    %cst_6 = arith.constant dense<0.000000e+00> : vector<128xf32>
    %11 = vector.multi_reduction <add>, %10, %cst_6 [0] : vector<8x128xf32> to vector<128xf32>
    %12 = vector.shape_cast %11 : vector<128xf32> to vector<1x128xf32>
    %cst_7 = arith.constant 1.250000e-01 : f32
    %13 = vector.broadcast %cst_7 : f32 to vector<1x128xf32>
    %14 = arith.mulf %12, %13 : vector<1x128xf32>
    %15 = arith.mulf %9, %9 : vector<1x128xf32>
    %16 = arith.subf %14, %15 : vector<1x128xf32>
    %cst_8 = arith.constant 0.000000e+00 : f32
    %17 = vector.broadcast %cst_8 : f32 to vector<1x128xf32>
    %18 = arith.maximumf %16, %17 : vector<1x128xf32>
    %c0_9 = arith.constant 0 : index
    %c0_10 = arith.constant 0 : index
    %19 = vector.load %arg4[%c0_9, %c0_10] : memref<1x128xf32, #tpu.memory_space<vmem>>, vector<1x128xf32>
    %cst_11 = arith.constant 9.99999974E-6 : f32
    %20 = vector.broadcast %cst_11 : f32 to vector<1x128xf32>
    %21 = arith.addf %18, %20 : vector<1x128xf32>
    %22 = math.rsqrt %21 : vector<1x128xf32>
    %23 = arith.mulf %19, %22 : vector<1x128xf32>
    %c0_12 = arith.constant 0 : index
    %c0_13 = arith.constant 0 : index
    %24 = vector.load %arg5[%c0_12, %c0_13] : memref<1x128xf32, #tpu.memory_space<vmem>>, vector<1x128xf32>
    %25 = arith.mulf %9, %23 : vector<1x128xf32>
    %26 = arith.subf %24, %25 : vector<1x128xf32>
    %27 = vector.broadcast %23 : vector<1x128xf32> to vector<8x128xf32>
    %28 = arith.mulf %5, %27 : vector<8x128xf32>
    %29 = vector.broadcast %26 : vector<1x128xf32> to vector<8x128xf32>
    %30 = arith.addf %28, %29 : vector<8x128xf32>
    %cst_14 = arith.constant 0.000000e+00 : f32
    %31 = vector.broadcast %cst_14 : f32 to vector<8x128xf32>
    %32 = arith.maximumf %30, %31 : vector<8x128xf32>
    %c0_15 = arith.constant 0 : index
    %c0_16 = arith.constant 0 : index
    %c0_17 = arith.constant 0 : index
    %33 = vector.load %arg8[%c0_15, %c0_16, %c0_17] : memref<1x8x128xf32, #tpu.memory_space<vmem>>, vector<1x8x128xf32>
    %34 = vector.shape_cast %33 : vector<1x8x128xf32> to vector<8x128xf32>
    %c0_18 = arith.constant 0 : index
    %c0_19 = arith.constant 0 : index
    %35 = vector.load %arg6[%c0_18, %c0_19] : memref<128x128xf32, #tpu.memory_space<vmem>>, vector<128x128xf32>
    %cst_20 = arith.constant dense<0.000000e+00> : vector<8x128xf32>
    %36 = tpu.matmul %32, %35, %cst_20 {dimension_numbers = #tpu.dot_dimension_numbers<[1], [0], [0], [1], [0, 0, 1, 1], [], []>} : vector<8x128xf32>, vector<128x128xf32>, vector<8x128xf32> -> vector<8x128xf32>
    %37 = arith.addf %34, %36 : vector<8x128xf32>
    %c0_21 = arith.constant 0 : index
    %c0_22 = arith.constant 0 : index
    %c0_23 = arith.constant 0 : index
    %38 = vector.load %arg8[%c0_21, %c0_22, %c0_23] : memref<1x8x128xf32, #tpu.memory_space<vmem>>, vector<1x8x128xf32>
    %39 = vector.shape_cast %38 : vector<1x8x128xf32> to vector<8x128xf32>
    %40 = vector.shape_cast %37 : vector<8x128xf32> to vector<1x8x128xf32>
    tpu.vector_store %arg8[%c0_21, %c0_22, %c0_23], %40 {strides = array<i32>} : memref<1x8x128xf32, #tpu.memory_space<vmem>>, vector<1x8x128xf32>,
    return
  }
  func.func @transform_0(%arg0: i32, %arg1: i32) -> (i32, i32) {
    %c0_i32 = arith.constant 0 : i32
    %c0_i32_0 = arith.constant 0 : i32
    %c0_i32_1 = arith.constant 0 : i32
    return %c0_i32, %c0_i32_0 : i32, i32
  }
  func.func @transform_1(%arg0: i32, %arg1: i32) -> (i32, i32) {
    %c2_i32 = arith.constant 2 : i32
    %0 = arith.muli %arg0, %c2_i32 : i32
    %1 = arith.addi %0, %arg1 : i32
    %c0_i32 = arith.constant 0 : i32
    %c0_i32_0 = arith.constant 0 : i32
    return %c0_i32, %1 : i32, i32
  }
  func.func @transform_2(%arg0: i32, %arg1: i32) -> (i32, i32) {
    %c2_i32 = arith.constant 2 : i32
    %0 = arith.muli %arg0, %c2_i32 : i32
    %1 = arith.addi %0, %arg1 : i32
    %c0_i32 = arith.constant 0 : i32
    %c0_i32_0 = arith.constant 0 : i32
    return %c0_i32, %1 : i32, i32
  }
  func.func @transform_3(%arg0: i32, %arg1: i32) -> (i32, i32) {
    %c2_i32 = arith.constant 2 : i32
    %0 = arith.muli %arg0, %c2_i32 : i32
    %1 = arith.addi %0, %arg1 : i32
    %c0_i32 = arith.constant 0 : i32
    %c0_i32_0 = arith.constant 0 : i32
    return %c0_i32, %1 : i32, i32
  }
  func.func @transform_4(%arg0: i32, %arg1: i32) -> (i32, i32) {
    %c2_i32 = arith.constant 2 : i32
    %0 = arith.muli %arg0, %c2_i32 : i32
    %1 = arith.addi %0, %arg1 : i32
    %c0_i32 = arith.constant 0 : i32
    %c0_i32_0 = arith.constant 0 : i32
    return %1, %c0_i32 : i32, i32
  }
  func.func @transform_5(%arg0: i32, %arg1: i32) -> (i32, i32) {
    %c0_i32 = arith.constant 0 : i32
    %c0_i32_0 = arith.constant 0 : i32
    %c0_i32_1 = arith.constant 0 : i32
    return %c0_i32, %c0_i32_0 : i32, i32
  }
  func.func @transform_6(%arg0: i32, %arg1: i32) -> (i32, i32, i32) {
    %c0_i32 = arith.constant 0 : i32
    %c0_i32_0 = arith.constant 0 : i32
    %c0_i32_1 = arith.constant 0 : i32
    return %arg0, %c0_i32, %c0_i32_0 : i32, i32, i32
  }
}

</mosaic_0001>

<bundles_post_ra>
// kernel: tpu_custom_call.1
= control target key start
LH: loop header
LB: loop body
LE: loop exit
PB: predicated region body
PF: predicated region fallthrough
CT: control target
= control target key end

     0   :  { %s1749_s0 = inlined_call_operand.hbm [shape: f32[8,128], index: 0, kind: input, shape index: {}]   ;;  %s1750_s1 = inlined_call_operand.hbm [shape: f32[128,512], index: 1, kind: input, shape index: {}]   ;;  %s1751_s2 = inlined_call_operand.hbm [shape: f32[1,512], index: 2, kind: input, shape index: {}]   ;;  %s1752_s3 = inlined_call_operand.vmem [shape: f32[1,512], index: 3, kind: input, shape index: {}]   ;;  %s1753_s4 = inlined_call_operand.hbm [shape: f32[512,128], index: 4, kind: input, shape index: {}]   ;;  %s1754_s5 = inlined_call_operand.vmem [shape: f32[1,128], index: 5, kind: input, shape index: {}]   ;;  %s1755_s6 = inlined_call_operand.hbm [shape: f32[2,8,128], index: 6, kind: output, shape index: {}]  }
   0x1   :  { %1769 = sst [smem:[#allocation22_spill]] %s1750_s1 }
   0x2   :  { %1770 = sst [smem:[#allocation23_spill]] %s1752_s3 }
   0x3   :  { %1771 = sst [smem:[#allocation24_spill]] %s1754_s5 }
   0x4   :  { %1772 = sst [smem:[#allocation25_spill]] %s1755_s6 }
   0x5   :  { %11 = vsyncpa [#allocation3], 0 }
   0x6   :  { %12 = vsyncpa [#allocation6], 0 }
   0x7   :  { %14 = vsyncpa [#allocation6 + $0x1], 0 }
   0x8   :  { %15 = vsyncpa [#allocation9], 0 }
   0x9   :  { %17 = vsyncpa [#allocation9 + $0x1], 0 }
   0xa   :  { %18 = vsyncpa [#allocation4], 0 }
   0xb   :  { %20 = vsyncpa [#allocation4 + $0x1], 0  ;;  %s1370_s21 = smov 0   ;;  %s1372_s22 = smov 0  }
   0xc   :  { %s1374_s23 = smov 0   ;;  %s1376_s24 = smov 0  }
   0xd   :  { %s1378_s25 = smov 0   ;;  %s1380_s26 = smov 0  }
   0xe   :  { %s1382_s27 = smov 0   ;;  %s1384_s28 = smov 0  }
   0xf   :  { %s1386_s29 = smov 0   ;;  %s1388_s30 = smov 0  }
  0x10   :  { %s1390_s7 = smov 0  }
  0x11 LB: > { %1773 = sst [smem:[#allocation15_spill]] %s1307_s27  ;;  %s35_s8 = sadd.s32 1, %s1315_s29  ;;  %s1323_s7 = sphi %s1390_s7, %s26_s7   ;;  %s1319_s30 = sphi %s1388_s30, %s1809_s30   ;;  %s1315_s29 = sphi %s1386_s29, %s1808_s29   ;;  %s1311_s28 = sphi %s1384_s28, %s1807_s28   ;;  %s1307_s27 = sphi %s1382_s27, %s1806_s27   ;;  %s1303_s26 = sphi %s1380_s26, %s1815_s26   ;;  %s1299_s25 = sphi %s1378_s25, %s1814_s25   ;;  %s1295_s24 = sphi %s1376_s24, %s1813_s24   ;;  %s1291_s23 = sphi %s1374_s23, %s1812_s23   ;;  %s1287_s22 = sphi %s1372_s22, %s1811_s22   ;;  %s1283_s21 = sphi %s1370_s21, %s1810_s21  }
  0x12   : > { %1774 = sst [smem:[#allocation16_spill]] %s1311_s28  ;;  %s38_s9 = sadd.s32 1, %s1319_s30 }
  0x13   : > { %1775 = sst [smem:[#allocation17_spill]] %s1315_s29  ;;  %p36_p0 = scmp.ge.s32.totalorder %s35_s8, 2 }
  0x14   : > { %1776 = sst [smem:[#allocation18_spill]] %s1319_s30  ;;  %s815_s10 = sshll.u32 %s1319_s30, 1 }
  0x15   : > { %s1429_s11 = sadd.s32 %s1315_s29, %s815_s10  ;;  %s70_s12 = sadd.s32 1, %s1303_s26 }
  0x16   : > { %s1817_s8 = smov (%p36_p0, %s35_s8), 0  ;;  %s1819_s9 = smov (!%p36_p0, %s38_s9), %s1319_s30 }
  0x17   : > { %1777 = sst [smem:[#allocation19_spill]] %s1817_s8  ;;  %p77_p1 = scmp.ne.s32.totalorder %s1303_s26, %s1299_s25 }
  0x18   : > { %p78_p2 = scmp.eq.s32.totalorder %s1323_s7, 0  ;;  %p40_p3 = scmp.ge.s32.totalorder %s1819_s9, 2 }
  0x19   : > { %p983_p5 = scmp.lt.s32.totalorder %s1323_s7, 4  ;;  %s258_s14 = sand.u32 1, %s1323_s7  }
  0x1a   : > { %p1438_p4 = por %p78_p2, %p77_p1  ;;  %s1821_s9 = smov (%p40_p3, %s1819_s9), 0 }
  0x1b   : > { %1779 = sst [smem:[#allocation20_spill]] %s1821_s9  ;;  %s1447_s15 = sand.u32 1, %s1303_s26  }
  0x1c   : > { %s816_s16 = sshll.u32 %s1821_s9, 1  ;;  %s1761_s18 = sshll.u32 %s1447_s15, 7 }
  0x1d   : > { %s66_s17 = sadd.s32 %s816_s16, %s1817_s8  ;;  %s828_s20 = sshll.u32 %s1429_s11, 7 }
  0x1e   : > { %s67_s19 = ssub.s32 %s1429_s11, %s66_s17  ;;  %s1780_s1 = sld [smem:[#allocation22_spill]] }
  0x1f   : > { %p68_p6 = scmp.eq.s32.totalorder %s67_s19, 0  ;;  %s262_s5 = scalar_lea.vmem [#allocation5], %s1761_s18 }
  0x20   : > { %s270_s3 = sshll.u32 %s262_s5, 4  ;;  %p1466_p7 = pnand %p983_p5, %p1438_p4  ;;  %s271_s3 = int_to_ptr.vmem [resolvable:$true] %s270_s3 }
  0x21   : > { %s1460_s27 = scalar_select %p68_p6, %s1303_s26, %s70_s12  }
  0x22   : > { %s1470_s16 = scalar_lea.sflag [#allocation6], %s258_s14  ;;  %p1767_p8 = pneg %p1466_p7 }
  0x23   : > { %1781 = sst [smem:[#allocation21_spill]] %s1460_s27  ;;  %s1098_s29 = scalar_lea.vmem %s271_s3, 2048 }
  0x24   : > { %s269_s6 = scalar_lea.hbm %s1780_s1, %s828_s20  ;;  %p1099_p9 = scmp.ne.s32.totalorder %s271_s3, %s1098_s29 }
  0x25   : > { %s1325_s5 = smov [#allocation5]  }
  0x26   : > { %p1101_p10 = pnand %p1099_p9, %p1767_p8  ;;  %s1103_s12 = sshll.u32 %s1325_s5, 4  ;;  %s1104_s12 = int_to_ptr.vmem [resolvable:$false] %s1103_s12 }
  0x27   : > { %s1105_s13 = scalar_lea.vmem %s1104_s12, 4096  ;;  %p1106_p12 = scmp.lt.s32.totalorder %s271_s3, %s1104_s12 }
  0x28   : > { %p1102_p11 = pneg %p1101_p10  ;;  %p1107_p13 = scmp.lt.s32.totalorder %s1105_s13, %s1098_s29 }
  0x2a   : > { %p1108_p0 = por %p1107_p13, %p1106_p12 }
  0x2c   : > { %p1109_p1 = pnand %p1108_p0, %p1102_p11 }
  0x2e   : > { %1112 = shalt.err (!%p1109_p1)
}
  0x2f   : > { %s1326_s17 = smov 512   ;;  %s1759_s14 = smov 128  }
  0x30   : > { %s1760_s19 = smov 8   ;;  %s1483_s20 = sadd.s32 4294967295, %s1323_s7  }
  0x31   : > { %971 = dma.hbm_to_vmem [thread:$0]  (!%p1466_p7), %s269_s6, 2048, %s271_s3, %s1470_s16, %s1326_s17, %s1759_s14, %s1760_s19  }
  0x32   : > { %s814_s10 = sadd.s32 4294967294, %s1323_s7   ;;  %p83_p2 = scmp.ne.s32.totalorder %s1299_s25, %s1295_s24 }
  0x33   : > { %p1766_p3 = scmp.eq.s32.totalorder %s1483_s20, 0  ;;  %s204_s29 = ssub.s32 %s1319_s30, %s1821_s9 }
  0x34   : > { %s207_s5 = sadd.s32 1, %s1291_s23  ;;  %p205_p5 = scmp.eq.s32.totalorder %s204_s29, 0 }
  0x35   : > { %p1494_p4 = por %p1766_p3, %p83_p2  ;;  %p217_p6 = scmp.ne.s32.totalorder %s1291_s23, %s1287_s22 }
  0x36   : > { %p218_p9 = scmp.eq.s32.totalorder %s1483_s20, 3  ;;  %p223_p11 = scmp.ne.s32.totalorder %s1287_s22, %s1283_s21 }
  0x37   : > { %s1783_s12 = scalar_select %p1494_p4, 1, 0 }
  0x38   : > { %s1502_s3 = scalar_select %p205_p5, %s1291_s23, %s207_s5  }
  0x39   : > { %p1504_p10 = por %p218_p9, %p217_p6  ;;  %p224_p12 = scmp.eq.s32.totalorder %s814_s10, 3 }
  0x3a   : > { %p823_p13 = scmp.ge.s32.totalorder %s1323_s7, 1  ;;  %p231_p0 = scmp.lt.s32.totalorder %s1323_s7, 5 }
  0x3b   : > { %s1784_s6 = scalar_select %p1504_p10, 1, 0 }
  0x3c   : > { %p1512_p1 = por %p224_p12, %p223_p11  ;;  %p1516_p2 = pnand %p823_p13, %p231_p0 }
  0x3d   : > { %s1329_s17 = smov [#allocation2]   ;;  %s830_s5 = sshll.u32 %s1429_s11, 4 }
  0x3e   : > { %s1785_s24 = scalar_select %p1512_p1, 1, 0 }
  0x3f   : > { %s244_s29 = sshll.u32 %s1329_s17, 4  ;;  %p964_p5 = pneg %p1516_p2  ;;  %s1520_s29 = int_to_ptr.vmem [resolvable:$true] %s244_s29 }
  0x40   : > { %s290_s19 = scalar_lea.hbm %s1751_s2, %s830_s5  ;;  %s283_s18 = scalar_lea.vmem [#allocation7], %s1447_s15 }
  0x41   : > { %s292_s1 = sshll.u32 %s283_s18, 4  ;;  %p1531_p6 = pnand %p964_p5, %p1766_p3  ;;  %s293_s1 = int_to_ptr.vmem [resolvable:$true] %s292_s1 }
  0x42   : > { %s1126_s8 = scalar_lea.vmem %s293_s1, 16  ;;  %s1330_s17 = smov [#allocation7]  }
  0x43   : > { %p1127_p9 = scmp.ne.s32.totalorder %s293_s1, %s1126_s8  ;;  %s1131_s30 = sshll.u32 %s1330_s17, 4  ;;  %s1132_s30 = int_to_ptr.vmem [resolvable:$false] %s1131_s30 }
  0x44   : > { %s1133_s27 = scalar_lea.vmem %s1132_s30, 32  ;;  %p1134_p13 = scmp.lt.s32.totalorder %s293_s1, %s1132_s30 }
  0x45   : > { %p1129_p11 = pnand %p1127_p9, %p1767_p8  ;;  %p1135_p0 = scmp.lt.s32.totalorder %s1133_s27, %s1126_s8 }
  0x47   : > { %p1130_p12 = pneg %p1129_p11  ;;  %p1136_p1 = por %p1135_p0, %p1134_p13 }
  0x49   : > { %p1137_p10 = pnand %p1136_p1, %p1130_p12 }
  0x4b   : > { %1140 = shalt.err (!%p1137_p10)
}
  0x4c   : > { %974 = dma.hbm_to_vmem [thread:$0]  (!%p1466_p7), %s290_s19, 16, %s293_s1, %s1470_s16  }
  0x4d   : > { %p1143_p5 = pneg %p1531_p6  ;;  %s1152_s18 = scalar_lea.vmem %s1520_s29, 128 }
  0x4e   : > { %p1153_p9 = scmp.ne.s32.totalorder %s1520_s29, %s1152_s18  ;;  %p1160_p8 = scmp.lt.s32.totalorder %s1520_s29, %s1520_s29 }
  0x4f   : > { %p1161_p4 = scmp.lt.s32.totalorder %s1152_s18, %s1152_s18 }
  0x50   : > { %p1155_p11 = pnand %p1153_p9, %p1143_p5 }
  0x51   : > { %p1162_p13 = por %p1161_p4, %p1160_p8 }
  0x52   : > { %p1156_p3 = pneg %p1155_p11 }
  0x54   : > { %p1163_p1 = pnand %p1162_p13, %p1156_p3 }
  0x56   : > { %1166 = shalt.err (!%p1163_p1)
}
  0x57   : > { %967 = dma.hbm_to_vmem [thread:$0]  (!%p1531_p6), %s1749_s0, 128, %s1520_s29, [#allocation3]  }
  0x58   : > { %s847_s1 = sshll.u32 %s1429_s11, 11  ;;  %s1788_s19 = sshll.u32 %s1447_s15, 7 }
  0x59   : > { %s321_s14 = scalar_lea.hbm %s1753_s4, %s847_s1  ;;  %s313_s5 = scalar_lea.vmem [#allocation8], %s1788_s19 }
  0x5a   : > { %s322_s10 = sshll.u32 %s313_s5, 4  ;;  %s310_s17 = scalar_lea.sflag [#allocation9], %s1447_s15  ;;  %s323_s10 = int_to_ptr.vmem [resolvable:$true] %s322_s10 }
  0x5b   : > { %s1180_s9 = scalar_lea.vmem %s323_s10, 2048  ;;  %p1789_p3 = pneg %p1466_p7 }
  0x5c   : > { %p1181_p8 = scmp.ne.s32.totalorder %s323_s10, %s1180_s9  ;;  %s1331_s18 = smov [#allocation8]  }
  0x5d   : > { %s1185_s27 = sshll.u32 %s1331_s18, 4  ;;  %s1186_s27 = int_to_ptr.vmem [resolvable:$false] %s1185_s27 }
  0x5e   : > { %p1183_p4 = pnand %p1181_p8, %p1789_p3  ;;  %s1187_s29 = scalar_lea.vmem %s1186_s27, 4096 }
  0x5f   : > { %p1188_p6 = scmp.lt.s32.totalorder %s323_s10, %s1186_s27  ;;  %p1189_p12 = scmp.lt.s32.totalorder %s1187_s29, %s1180_s9 }
  0x60   : > { %p1184_p10 = pneg %p1183_p4 }
  0x61   : > { %p1190_p0 = por %p1189_p12, %p1188_p6 }
  0x63   : > { %p1191_p5 = pnand %p1190_p0, %p1184_p10 }
  0x65   : > { %1194 = shalt.err (!%p1191_p5)
}
  0x66   : > { %s1790_s11 = smov 8   ;;  %s1791_s30 = smov 128  }
  0x67   : > { %977 = dma.hbm_to_vmem [thread:$0]  (!%p1466_p7), %s321_s14, 2048, %s323_s10, %s310_s17, %s1791_s30, %s1791_s30, %s1790_s11  }
  0x68   : > { %334 = sbr.rel (%p1516_p2) target bundleno = 620 (0x26c), region = 44  ;;  %p1792_p9 = scmp.eq.s32.totalorder (!%p1516_p2), %s1483_s20, 0 }
  0x6d   : > { %1266 = dma.done.wait (%p1792_p9), [#allocation3], 128   ;;  %p1793_p11 = pmov %p1792_p9 }
  0x6e   : > { %s340_s15 = sand.u32 1, %s1483_s20   ;;  %s1576_s1 = sand.u32 1, %s1299_s25  }
  0x6f   : > { %1268 = vsyncadd (%p1793_p11), [#allocation3], 4294967168  ;;  %s837_s28 = sshll.u32 %s1576_s1, 7  ;;  %s341_s8 = scalar_lea.sflag [#allocation6], %s340_s15 }
  0x70   : > { %s1579_s16 = scalar_lea.vmem [#allocation5], %s837_s28  ;;  %p1794_p7 = scmp.ne.s32.totalorder %s1783_s12, 0 }
  0x72   : > { %1270 = dma.done.wait (%p1794_p7), %s341_s8, 2064  }
  0x73   : > { %1272 = vsyncadd (%p1794_p7), %s341_s8, 4294965232  ;;  %s352_s13 = scalar_lea.vmem [#allocation7], %s1576_s1  ;;  %s358_s14 = scalar_lea.sflag [#allocation9], %s1576_s1 }
  0x74   : > { %s1587_s19 = scalar_lea.vmem [#allocation8], %s837_s28 }
  0x75   : > { %1274 = dma.done.wait (%p1794_p7), %s358_s14, 2048  }
  0x76   : > { %1276 = vsyncadd (%p1794_p7), %s358_s14, 4294965248  ;;  %s1795_s20 = sld [smem:[#allocation16_spill]]  ;;  %s401_s10 = sand.u32 1, %s1287_s22  }
  0x77   : > { %s1796_s5 = sld [smem:[#allocation15_spill]]  ;;  %s839_s9 = sshll.u32 %s401_s10, 3 }
  0x78   : > { %s1797_s11 = sld [smem:[#allocation23_spill]]  ;;  %s1604_s15 = scalar_lea.vmem [#allocation10], %s839_s9 }
  0x7c   : > { %s840_s17 = sshll.u32 %s1795_s20, 1 }
  0x7d   : > { %s409_s18 = sadd.s32 %s1796_s5, %s840_s17  ;;  %p841_p13 = scmp.ne.s32.totalorder %s1796_s5, 0 }
  0x7e   : > { %p410_p2 = scmp.lt.s32.totalorder %s409_s18, 3  ;;  %s1798_s12 = sld [smem:[#allocation16_spill]] (!%p841_p13) }
  0x7f   : > { %421 = sbr.rel (%p841_p13) target bundleno = 138 (0x8a), region = 64  ;;  %s1799_s20 = sld [smem:[#allocation24_spill]] (!%p841_p13) }
  0x80   : > { %s1823_s18 = smov (!%p410_p2, %s409_s18), 3 }
  0x81   : > { %s412_s30 = scalar_lea.vmem %s1797_s11, %s1823_s18 }
  0x84   : > { %p429_p1 = scmp.eq.s32.totalorder %s1798_s12, 0 }
  0x86   : > { %s1081_s28 = scalar_select %p429_p1, 255, 0 }
  0x88   : > { %v1082_v0 = vld [vmem:[%s1799_s20] ss:$0 sm:%s1081_s28] }
  0x89   : > { %434 = vst [vmem:[%s1604_s15] sm:$0xff] %v1082_v0 }
  0x8a PF: > { %v451_v1 = vld [vmem:[%s1579_s16 + $0x78] sm:$0xff]  ;;  %v1332_v2 = vmov 0.0   ;;  %v450_v3 = vld [vmem:[%s1579_s16 + $0x70] sm:$0xff]  ;;  %vm1333_vm0 = vmmov 0   ;;  %v449_v4 = vld [vmem:[%s1579_s16 + $0x68] sm:$0xff]  ;;  %v548_v56 = vlaneseq  ;;  %s1802_s18 = sld [smem:[#allocation25_spill]] }
  0x8b   : > { %882 = vmatprep.subr.mxu0 %v1332_v2  ;;  %914 = vmatprep.mubr.msk.f32.mxu0 %vm1333_vm0, %v1332_v2  ;;  %v448_v5 = vld [vmem:[%s1579_s16 + $0x60] sm:$0xff]  ;;  %v447_v6 = vld [vmem:[%s1579_s16 + $0x58] sm:$0xff]  ;;  %v446_v7 = vld [vmem:[%s1579_s16 + $0x50] sm:$0xff]  ;;  %s652_s11 = scalar_lea.sflag [#allocation4], %s401_s10  ;;  %p1803_p3 = scmp.ne.s32.totalorder %s1784_s6, 0 }
  0x8c   : > { %883 = vmatpush3.msra.mxu0 %v451_v1  ;;  %917 = vmatprep.subr.mxu1 %v1332_v2  ;;  %v445_v8 = vld [vmem:[%s1579_s16 + $0x48] sm:$0xff]  ;;  %v444_v9 = vld [vmem:[%s1579_s16 + $0x40] sm:$0xff]  ;;  %v443_v10 = vld [vmem:[%s1579_s16 + $0x38] sm:$0xff]  ;;  %v549_v57 = vshrl.u32 %v548_v56, 7  ;;  %s1334_s12 = smov [#allocation10]  }
  0x8d   : > { %884 = vmatprep.subr.mxu0 %v1332_v2  ;;  %949 = vmatprep.mubr.msk.f32.mxu1 %vm1333_vm0, %v1332_v2  ;;  %v442_v11 = vld [vmem:[%s1579_s16 + $0x30] sm:$0xff]  ;;  %v441_v12 = vld [vmem:[%s1579_s16 + $0x28] sm:$0xff]  ;;  %v440_v13 = vld [vmem:[%s1579_s16 + $0x20] sm:$0xff]  ;;  %s1199_s28 = sshll.u32 %s1334_s12, 4  ;;  %s1200_s28 = int_to_ptr.vmem [resolvable:$false] %s1199_s28 }
  0x8e   : > { %885 = vmatpush3.msra.mxu0 %v450_v3  ;;  %v439_v14 = vld [vmem:[%s1579_s16 + $0x18] sm:$0xff]  ;;  %v438_v15 = vld [vmem:[%s1579_s16 + $0x10] sm:$0xff]  ;;  %v437_v16 = vld [vmem:[%s1579_s16 + $0x8] sm:$0xff]  ;;  %v550_v59 = vsub.s32 0, %v549_v57  ;;  %s1201_s8 = scalar_lea.vmem %s1200_s28, 256 }
  0x8f   : > { %886 = vmatprep.subr.mxu0 %v1332_v2  ;;  %v436_v17 = vld [vmem:[%s1579_s16] sm:$0xff]  ;;  %v435_v18 = vld [vmem:[#allocation2] sm:$0xff]  ;;  %v576_v21 = vld [vmem:[%s1587_s19 + $0x68] sm:$0xff]  ;;  %s1800_s16 = sld [smem:[#allocation16_spill]] }
  0x90   : > { %887 = vmatpush3.msra.mxu0 %v449_v4  ;;  %v578_v19 = vld [vmem:[%s1587_s19 + $0x78] sm:$0xff]  ;;  %v577_v20 = vld [vmem:[%s1587_s19 + $0x70] sm:$0xff]  ;;  %v575_v22 = vld [vmem:[%s1587_s19 + $0x60] sm:$0xff] }
  0x91   : > { %888 = vmatprep.subr.mxu0 %v1332_v2  ;;  %918 = vmatpush3.msra.mxu1 %v578_v19  ;;  %v574_v23 = vld [vmem:[%s1587_s19 + $0x58] sm:$0xff]  ;;  %v573_v24 = vld [vmem:[%s1587_s19 + $0x50] sm:$0xff]  ;;  %v572_v25 = vld [vmem:[%s1587_s19 + $0x48] sm:$0xff] }
  0x92   : > { %889 = vmatpush3.msra.mxu0 %v448_v5  ;;  %919 = vmatprep.subr.mxu1 %v1332_v2  ;;  %v571_v26 = vld [vmem:[%s1587_s19 + $0x40] sm:$0xff]  ;;  %v570_v27 = vld [vmem:[%s1587_s19 + $0x38] sm:$0xff]  ;;  %v569_v28 = vld [vmem:[%s1587_s19 + $0x30] sm:$0xff] }
  0x93   : > { %890 = vmatprep.subr.mxu0 %v1332_v2  ;;  %920 = vmatpush3.msra.mxu1 %v577_v20  ;;  %v568_v29 = vld [vmem:[%s1587_s19 + $0x28] sm:$0xff]  ;;  %v567_v30 = vld [vmem:[%s1587_s19 + $0x20] sm:$0xff]  ;;  %v566_v31 = vld [vmem:[%s1587_s19 + $0x18] sm:$0xff] }
  0x94   : > { %891 = vmatpush3.msra.mxu0 %v447_v6  ;;  %921 = vmatprep.subr.mxu1 %v1332_v2  ;;  %v565_v32 = vld [vmem:[%s1587_s19 + $0x10] sm:$0xff]  ;;  %v564_v33 = vld [vmem:[%s1587_s19 + $0x8] sm:$0xff]  ;;  %v563_v34 = vld [vmem:[%s1587_s19] sm:$0xff] }
  0x95   : > { %892 = vmatprep.subr.mxu0 %v1332_v2  ;;  %922 = vmatpush3.msra.mxu1 %v576_v21  ;;  %v540_v58 = vld [vmem:[%s352_s13] sm:$0x1]  ;;  %v562_v6 = vld [vmem:[%s1604_s15] sm:$0xff]  ;;  %s844_s1 = sshll.u32 %s1800_s16, 7  ;;  %s665_s13 = sshll.u32 %s1604_s15, 4  ;;  %s666_s13 = int_to_ptr.vmem [resolvable:$true] %s665_s13 }
  0x96   : > { %893 = vmatpush3.msra.mxu0 %v446_v7  ;;  %923 = vmatprep.subr.mxu1 %v1332_v2  ;;  %v544_v62 = vld [vmem:[%s412_s30] sm:$0x1]  ;;  %s1691_s29 = scalar_lea.hbm %s1802_s18, %s844_s1  ;;  %s1195_s30 = scalar_lea.vmem %s666_s13, 128 }
  0x97   : > { %894 = vmatprep.subr.mxu0 %v1332_v2  ;;  %924 = vmatpush3.msra.mxu1 %v575_v22  ;;  %p1196_p8 = scmp.ne.s32.totalorder %s666_s13, %s1195_s30  ;;  %p1202_p6 = scmp.lt.s32.totalorder %s666_s13, %s1200_s28 }
  0x98   : > { %895 = vmatpush3.msra.mxu0 %v445_v8  ;;  %925 = vmatprep.subr.mxu1 %v1332_v2  ;;  %p1203_p12 = scmp.lt.s32.totalorder %s1201_s8, %s1195_s30 }
  0x99   : > { %896 = vmatprep.subr.mxu0 %v1332_v2  ;;  %926 = vmatpush3.msra.mxu1 %v574_v23  ;;  %p1197_p4 = pnand %p1196_p8, %p1803_p3 }
  0x9a   : > { %897 = vmatpush3.msra.mxu0 %v444_v9  ;;  %927 = vmatprep.subr.mxu1 %v1332_v2  ;;  %p1204_p0 = por %p1203_p12, %p1202_p6 }
  0x9b   : > { %898 = vmatprep.subr.mxu0 %v1332_v2  ;;  %928 = vmatpush3.msra.mxu1 %v573_v24  ;;  %p1198_p10 = pneg %p1197_p4 }
  0x9c   : > { %899 = vmatpush3.msra.mxu0 %v443_v10  ;;  %929 = vmatprep.subr.mxu1 %v1332_v2 }
  0x9d   : > { %900 = vmatprep.subr.mxu0 %v1332_v2  ;;  %930 = vmatpush3.msra.mxu1 %v572_v25  ;;  %p1205_p5 = pnand %p1204_p0, %p1198_p10 }
  0x9e   : > { %901 = vmatpush3.msra.mxu0 %v442_v11  ;;  %931 = vmatprep.subr.mxu1 %v1332_v2 }
  0x9f   : > { %902 = vmatprep.subr.mxu0 %v1332_v2  ;;  %932 = vmatpush3.msra.mxu1 %v571_v26 }
  0xa0   : > { %903 = vmatpush3.msra.mxu0 %v441_v12  ;;  %933 = vmatprep.subr.mxu1 %v1332_v2 }
  0xa1   : > { %904 = vmatprep.subr.mxu0 %v1332_v2  ;;  %934 = vmatpush3.msra.mxu1 %v570_v27 }
  0xa2   : > { %905 = vmatpush3.msra.mxu0 %v440_v13  ;;  %935 = vmatprep.subr.mxu1 %v1332_v2 }
  0xa3   : > { %906 = vmatprep.subr.mxu0 %v1332_v2  ;;  %936 = vmatpush3.msra.mxu1 %v569_v28 }
  0xa4   : > { %907 = vmatpush3.msra.mxu0 %v439_v14  ;;  %937 = vmatprep.subr.mxu1 %v1332_v2 }
  0xa5   : > { %908 = vmatprep.subr.mxu0 %v1332_v2  ;;  %938 = vmatpush3.msra.mxu1 %v568_v29 }
  0xa6   : > { %909 = vmatpush3.msra.mxu0 %v438_v15  ;;  %939 = vmatprep.subr.mxu1 %v1332_v2 }
  0xa7   : > { %910 = vmatprep.subr.mxu0 %v1332_v2  ;;  %940 = vmatpush3.msra.mxu1 %v567_v30 }
  0xa8   : > { %911 = vmatpush3.msra.mxu0 %v437_v16  ;;  %941 = vmatprep.subr.mxu1 %v1332_v2 }
  0xa9   : > { %912 = vmatprep.subr.mxu0 %v1332_v2  ;;  %942 = vmatpush3.msra.mxu1 %v566_v31 }
  0xaa   : > { %913 = vmatpush3.msra.mxu0 %v436_v17  ;;  %943 = vmatprep.subr.mxu1 %v1332_v2 }
  0xab   : > { %915 = vmatmul.mubr.f32.vlgmr.msra.gmra.mxu0 %v435_v18  ;;  %944 = vmatpush3.msra.mxu1 %v565_v32 }
  0xac   : > { %945 = vmatprep.subr.mxu1 %v1332_v2 }
  0xad   : > { %946 = vmatpush3.msra.mxu1 %v564_v33 }
  0xae   : > { %947 = vmatprep.subr.mxu1 %v1332_v2 }
  0xaf   : > { %948 = vmatpush3.msra.mxu1 %v563_v34 }
 0x16b   : > { %v518_v35 = vpop.f32.mrf.mxu0 }
 0x16c   : > { %v522_v36 = vrot.slane %v518_v35, 4  ;;  %v529_v37 = vmul.f32 %v518_v35, %v518_v35 }
 0x16d   : > { %v916_v38 = vpop.f32.mrf.mxu0 }
 0x16e   : > { %v523_v39 = vadd.f32 %v522_v36, %v518_v35  ;;  %v530_v40 = vrot.slane %v529_v37, 4 }
 0x170   : > { %v524_v41 = vrot.slane %v523_v39, 2  ;;  %v531_v42 = vadd.f32 %v530_v40, %v529_v37 }
 0x172   : > { %v525_v43 = vadd.f32 %v524_v41, %v523_v39  ;;  %v532_v44 = vrot.slane %v531_v42, 2 }
 0x174   : > { %v526_v45 = vrot.slane %v525_v43, 1  ;;  %v533_v46 = vadd.f32 %v532_v44, %v531_v42 }
 0x176   : > { %v527_v47 = vadd.f32 %v526_v45, %v525_v43  ;;  %v534_v48 = vrot.slane %v533_v46, 1 }
 0x178   : > { %v528_v49 = vmul.f32 0.125, %v527_v47  ;;  %v535_v50 = vadd.f32 %v534_v48, %v533_v46 }
 0x17a   : > { %v536_v51 = vmul.f32 0.125, %v535_v50  ;;  %v537_v52 = vmul.f32 %v528_v49, %v528_v49 }
 0x17c   : > { %v538_v53 = vsub.f32 %v536_v51, %v537_v52 }
 0x17e   : > { %v539_v54 = vmax.f32 %v538_v53, 0.0 }
 0x180   : > { %v541_v55 = vadd.f32 1e-05, %v539_v54 }
 0x182   : > { %1083 = vrsqrt.f32 %v541_v55 }
 0x18f   : > { %v1084_v60 = vpop.eup %1083 }
 0x190   : > { %v543_v61 = vmul.f32 %v1084_v60, %v540_v58 }
 0x192   : > { %v551_v63 = vrot.slane %v543_v61, %v550_v59  ;;  %v545_v0 = vmul.f32 %v543_v61, %v528_v49 }
 0x194   : > { %v546_v1 = vsub.f32 %v544_v62, %v545_v0  ;;  %v553_v2 = vmul.f32 %v551_v63, %v518_v35 }
 0x196   : > { %v558_v3 = vrot.slane %v546_v1, %v550_v59 }
 0x198   : > { %v560_v4 = vadd.f32 %v558_v3, %v553_v2 }
 0x19a   : > { %v561_v5 = vmax.f32 %v560_v4, 0.0 }
 0x19c   : > { %950 = vmatmul.mubr.f32.vlgmr.msra.gmra.mxu1 %v561_v5 }
 0x25c   : > { %v645_v7 = vpop.f32.mrf.mxu1 }
 0x25d   : > { %v649_v8 = vadd.f32 %v645_v7, %v562_v6 }
 0x25e   : > { %v951_v9 = vpop.f32.mrf.mxu1 }
 0x25f   : > { %650 = vst [vmem:[%s1604_s15] sm:$0xff] %v649_v8 }
 0x260   : > { %1208 = shalt.err (!%p1205_p5)
}
 0x261   : > { %s1209_s15 = scalar_lea.hbm %s1691_s29, 128  ;;  %s1213_s20 = scalar_lea.hbm %s1802_s18, 256 }
 0x262   : > { %p1210_p9 = scmp.ne.s32.totalorder %s1691_s29, %s1209_s15  ;;  %p1214_p2 = scmp.lt.s32.totalorder %s1691_s29, %s1802_s18 }
 0x263   : > { %p1215_p13 = scmp.lt.s32.totalorder %s1213_s20, %s1209_s15 }
 0x264   : > { %p1211_p11 = pnand %p1210_p9, %p1803_p3 }
 0x265   : > { %p1216_p1 = por %p1215_p13, %p1214_p2 }
 0x266   : > { %p1212_p7 = pneg %p1211_p11 }
 0x268   : > { %p1217_p8 = pnand %p1216_p1, %p1212_p7 }
 0x26a   : > { %1220 = shalt.err (!%p1217_p8)
}
 0x26b   : > { %962 = dma.vmem_to_hbm [thread:$0]  (%p1803_p3), %s666_s13, 128, %s1691_s29, %s652_s11  }
 0x26c PF: > { %p985_p4 = scmp.ge.s32.totalorder %s1323_s7, 2  ;;  %s677_s5 = sand.u32 1, %s1283_s21  }
 0x26d   : > { %p1804_p10 = scmp.ne.s32.totalorder %s1785_s24, 0  ;;  %s678_s17 = scalar_lea.sflag [#allocation4], %s677_s5 }
 0x26f   : > { %p979_p6 = pnand %p985_p4, %p1804_p10 }
 0x271   : > { %p980_p12 = pneg %p979_p6 }
 0x273   : > { %1278 = dma.done.wait (%p980_p12), %s678_s17, 128  }
 0x274   : > { %1280 = vsyncadd (%p980_p12), %s678_s17, 4294967168  ;;  %s26_s7 = sadd.s32 1, %s1323_s7   ;;  %s1805_s6 = sld [smem:[#allocation21_spill]] }
 0x275   : > { %p23_p0 = scmp.ge.s32.totalorder %s26_s7, 6   ;;  %s1806_s27 = sld [smem:[#allocation17_spill]] }
 0x276   : > { %s1807_s28 = sld [smem:[#allocation18_spill]]  ;;  %s1810_s21 = smov %s1287_s22 }
 0x277   : > { %s1808_s29 = sld [smem:[#allocation19_spill]]  ;;  %s1811_s22 = smov %s1291_s23 }
 0x278   : > { %s1809_s30 = sld [smem:[#allocation20_spill]]  ;;  %s1812_s23 = smov %s1502_s3 }
 0x279   : > { %s1813_s24 = smov %s1299_s25  ;;  %s1814_s25 = smov %s1303_s26 }
 0x27a   : > { %s1815_s26 = smov %s1805_s6  ;;  %25 = sbr.rel (!%p23_p0) target bundleno = 17 (0x11), region = 125 }
 0x27f   :  { %683 = vsyncpa [#allocation3], 1 }
 0x280   :  { %685 = vsyncpa [#allocation3 + $0x1], 1 }
 0x281   :  { %686 = vsyncpa [#allocation6], 1 }
 0x282   :  { %688 = vsyncpa [#allocation6 + $0x1], 1 }
 0x283   :  { %689 = vsyncpa [#allocation9], 1 }
 0x284   :  { %691 = vsyncpa [#allocation9 + $0x1], 1 }
 0x285   :  { %692 = vsyncpa [#allocation4], 1 }
 0x286   :  { %694 = vsyncpa [#allocation4 + $0x1], 1 }

</bundles_post_ra>
